<compile_context>
chip_gen: v7x
topology: tpu7x:2x2x1
jax: 0.10.0
libtpu: 0.0.40
codegen_flags: <defaults>
</compile_context>

<pallas_src>
import functools

import jax
import jax.numpy as jnp
from jax.experimental import pallas as pl
from jax.experimental.pallas import tpu as pltpu

CLS_WEIGHT = 0.3
HUBER_DELTA = 0.1
LANE = 128
MAX_BLOCK_ROWS = 1024  # 1024*128*4B = 512 KiB per input block -> fits all chips


def _combined_loss_kernel(reg_ref, dir_ref, tgt_ref, out_ref, acc_h, acc_b,
                          *, n, inv_n, block_rows, needs_mask):
    step = pl.program_id(0)

    @pl.when(step == 0)
    def _init():
        acc_h[...] = jnp.zeros_like(acc_h)
        acc_b[...] = jnp.zeros_like(acc_b)

    # Cast after load (inputs stay in their native dtype in HBM).
    reg = reg_ref[...].astype(jnp.float32)
    logits = dir_ref[...].astype(jnp.float32)
    tgt = tgt_ref[...].astype(jnp.float32)

    # ---- Huber loss, delta = 0.1 (elementwise) ----
    diff = reg - tgt
    adiff = jnp.abs(diff)
    huber = jnp.where(
        adiff <= HUBER_DELTA,
        0.5 * diff * diff,
        HUBER_DELTA * (adiff - 0.5 * HUBER_DELTA),
    )

    # ---- BCEWithLogits vs (targets > 0), numerically stable form ----
    y = (tgt > 0.0).astype(jnp.float32)
    bce = (jnp.maximum(logits, 0.0)
           - logits * y
           + jnp.log1p(jnp.exp(-jnp.abs(logits))))

    if needs_mask:
        # Global flattened element index; everything >= n is padding / garbage
        # from the ragged last block and must not contribute.
        row = jax.lax.broadcasted_iota(jnp.int32, huber.shape, 0) + step * block_rows
        col = jax.lax.broadcasted_iota(jnp.int32, huber.shape, 1)
        valid = (row * LANE + col) < n
        huber = jnp.where(valid, huber, 0.0)
        bce = jnp.where(valid, bce, 0.0)

    # Pure VALU accumulation; no cross-lane reductions inside the grid loop.
    acc_h[...] += huber
    acc_b[...] += bce

    @pl.when(step == pl.num_programs(0) - 1)
    def _finalize():
        reg_loss = jnp.sum(acc_h[...]) * inv_n
        cls_loss = jnp.sum(acc_b[...]) * inv_n
        comb = reg_loss + CLS_WEIGHT * cls_loss
        # Pack the three scalars into one lane-dense output row:
        # lane 0 = combined, lane 1 = reg_loss, lane 2 = cls_loss.
        lane = jax.lax.broadcasted_iota(jnp.int32, (1, LANE), 1)
        packed = jnp.where(lane == 0, comb,
                 jnp.where(lane == 1, reg_loss,
                 jnp.where(lane == 2, cls_loss, 0.0)))
        out_ref[...] = packed


def combined_loss(reg_pred, dir_pred, targets):
    """Mirrors CombinedLoss.forward: returns (combined, reg_loss, cls_loss)."""
    reg = jnp.squeeze(reg_pred).reshape(-1)
    logit = jnp.squeeze(dir_pred).reshape(-1)
    tgt = jnp.asarray(targets).reshape(-1)
    assert reg.shape == logit.shape == tgt.shape, "shape mismatch after squeeze"

    n = reg.shape[0]
    assert n > 0, "CombinedLoss requires at least one element (mean reduction)"

    # Lane-dense (rows, 128) layout; pad only the ragged tail (<128 elements).
    npad = ((n + LANE - 1) // LANE) * LANE
    rows = npad // LANE
    pad = npad - n

    def _prep(x):
        if pad:
            x = jnp.pad(x, (0, pad))
        return x.reshape(rows, LANE)

    reg2 = _prep(reg)
    logit2 = _prep(logit)
    tgt2 = _prep(tgt)

    # Block of rows: whole array if small, otherwise MAX_BLOCK_ROWS (mult of 8).
    block_rows = rows if rows <= MAX_BLOCK_ROWS else MAX_BLOCK_ROWS
    grid = pl.cdiv(rows, block_rows)
    # Tail masking is only needed if the padded grid covers more than n elems.
    needs_mask = (grid * block_rows * LANE) != n

    kernel = functools.partial(
        _combined_loss_kernel,
        n=n,
        inv_n=1.0 / n,
        block_rows=block_rows,
        needs_mask=needs_mask,
    )

    in_spec = pl.BlockSpec((block_rows, LANE), lambda i: (i, 0))
    out_spec = pl.BlockSpec((1, LANE), lambda i: (0, 0))

    out = pl.pallas_call(
        kernel,
        out_shape=jax.ShapeDtypeStruct((1, LANE), jnp.float32),
        grid=(grid,),
        in_specs=[in_spec, in_spec, in_spec],
        out_specs=out_spec,
        scratch_shapes=[
            pltpu.VMEM((block_rows, LANE), jnp.float32),
            pltpu.VMEM((block_rows, LANE), jnp.float32),
        ],
        compiler_params=pltpu.CompilerParams(
            dimension_semantics=("arbitrary",),
        ),
    )(reg2, logit2, tgt2)

    # TODO(synk): for v7x a leading size-2 "parallel" grid axis with per-core
    # partial sums (combined in the wrapper) could use both TensorCores.
    return out[0, 0], out[0, 1], out[0, 2]


def _reference(reg_pred, dir_pred, targets):
    """Pure-JAX reference for sanity checking."""
    reg = jnp.squeeze(reg_pred).astype(jnp.float32)
    logit = jnp.squeeze(dir_pred).astype(jnp.float32)
    tgt = jnp.asarray(targets, jnp.float32)
    diff = reg - tgt
    ad = jnp.abs(diff)
    huber = jnp.where(ad <= HUBER_DELTA, 0.5 * diff * diff,
                      HUBER_DELTA * (ad - 0.5 * HUBER_DELTA))
    reg_loss = jnp.mean(huber)
    y = (tgt > 0).astype(jnp.float32)
    bce = jnp.maximum(logit, 0.0) - logit * y + jnp.log1p(jnp.exp(-jnp.abs(logit)))
    cls_loss = jnp.mean(bce)
    return reg_loss + CLS_WEIGHT * cls_loss, reg_loss, cls_loss


def _check(reg_pred, dir_pred, targets, atol=1e-5, rtol=1e-4):
    comb, reg_loss, cls_loss = combined_loss(reg_pred, dir_pred, targets)
    jax.block_until_ready((comb, reg_loss, cls_loss))
    r_comb, r_reg, r_cls = _reference(reg_pred, dir_pred, targets)
    assert jnp.allclose(comb, r_comb, atol=atol, rtol=rtol), (comb, r_comb)
    assert jnp.allclose(reg_loss, r_reg, atol=atol, rtol=rtol), (reg_loss, r_reg)
    assert jnp.allclose(cls_loss, r_cls, atol=atol, rtol=rtol), (cls_loss, r_cls)


if __name__ == "__main__":
    key = jax.random.PRNGKey(0)
    k1, k2, k3, k4, k5, k6 = jax.random.split(key, 6)

    # Small case matching the module's typical use: (B, 1) heads, (B,) targets.
    B = 8
    reg_pred = 0.05 * jax.random.normal(k1, (B, 1), jnp.float32)  # regression head
    dir_pred = jax.random.normal(k2, (B, 1), jnp.float32)         # direction logits
    targets = 0.05 * jax.random.normal(k3, (B,), jnp.float32)     # 1-hr returns
    _check(reg_pred, dir_pred, targets)

    # Larger case exercising the multi-block grid + ragged tail masking path.
    N = 150_000  # rows = 1172 -> 2 grid steps with a partial last block
    reg_big = 0.05 * jax.random.normal(k4, (N, 1), jnp.float32)
    dir_big = jax.random.normal(k5, (N, 1), jnp.float32)
    tgt_big = 0.05 * jax.random.normal(k6, (N,), jnp.float32)
    _check(reg_big, dir_big, tgt_big)

    print("KERNEL_OK")
</pallas_src>

<mosaic_0001>
module attributes {stable_mosaic.version = 11 : i64} {
  func.func @_combined_loss_kernel(%arg0: i32, %arg1: memref<1x128xf32, #tpu.memory_space<vmem>>, %arg2: memref<1x128xf32, #tpu.memory_space<vmem>>, %arg3: memref<1x128xf32, #tpu.memory_space<vmem>>, %arg4: memref<1x128xf32, #tpu.memory_space<vmem>>, %arg5: memref<1x128xf32, #tpu.memory_space<vmem>>, %arg6: memref<1x128xf32, #tpu.memory_space<vmem>>) attributes {dimension_semantics = [#tpu.dimension_semantics<arbitrary>], iteration_bounds = array<i64: 1>, scalar_prefetch = 0 : i64, scratch_operands = 2 : i64, tpu.core_type = #tpu.core_type<tc>, window_params = [{transform_indices = @transform_0, window_bounds = array<i64: 1, 128>}, {transform_indices = @transform_1, window_bounds = array<i64: 1, 128>}, {transform_indices = @transform_2, window_bounds = array<i64: 1, 128>}, {pipeline_mode = #tpu.pipeline_mode<synchronous>, transform_indices = @transform_3, window_bounds = array<i64: 1, 128>}]} {
    %c0_i32 = arith.constant 0 : i32
    %0 = arith.cmpi eq, %arg0, %c0_i32 : i32
    %1 = arith.extui %0 : i1 to i32
    %c0_i32_0 = arith.constant 0 : i32
    %2 = arith.cmpi ne, %1, %c0_i32_0 : i32
    scf.if %2 {
      %cst_24 = arith.constant 0.000000e+00 : f32
      %55 = vector.broadcast %cst_24 : f32 to vector<1x128xf32>
      %c0_25 = arith.constant 0 : index
      %c0_26 = arith.constant 0 : index
      %56 = vector.load %arg5[%c0_25, %c0_26] : memref<1x128xf32, #tpu.memory_space<vmem>>, vector<1x128xf32>
      tpu.vector_store %arg5[%c0_25, %c0_26], %55 {strides = array<i32>} : memref<1x128xf32, #tpu.memory_space<vmem>>, vector<1x128xf32>,
      %cst_27 = arith.constant 0.000000e+00 : f32
      %57 = vector.broadcast %cst_27 : f32 to vector<1x128xf32>
      %c0_28 = arith.constant 0 : index
      %c0_29 = arith.constant 0 : index
      %58 = vector.load %arg6[%c0_28, %c0_29] : memref<1x128xf32, #tpu.memory_space<vmem>>, vector<1x128xf32>
      tpu.vector_store %arg6[%c0_28, %c0_29], %57 {strides = array<i32>} : memref<1x128xf32, #tpu.memory_space<vmem>>, vector<1x128xf32>,
    } else {
    }
    %c0 = arith.constant 0 : index
    %c0_1 = arith.constant 0 : index
    %3 = vector.load %arg1[%c0, %c0_1] : memref<1x128xf32, #tpu.memory_space<vmem>>, vector<1x128xf32>
    %c0_2 = arith.constant 0 : index
    %c0_3 = arith.constant 0 : index
    %4 = vector.load %arg2[%c0_2, %c0_3] : memref<1x128xf32, #tpu.memory_space<vmem>>, vector<1x128xf32>
    %c0_4 = arith.constant 0 : index
    %c0_5 = arith.constant 0 : index
    %5 = vector.load %arg3[%c0_4, %c0_5] : memref<1x128xf32, #tpu.memory_space<vmem>>, vector<1x128xf32>
    %6 = arith.subf %3, %5 : vector<1x128xf32>
    %7 = math.absf %6 : vector<1x128xf32>
    %cst = arith.constant 1.000000e-01 : f32
    %8 = vector.broadcast %cst : f32 to vector<1x128xf32>
    %9 = arith.cmpf ole, %7, %8 : vector<1x128xf32>
    %cst_6 = arith.constant 5.000000e-01 : f32
    %10 = vector.broadcast %cst_6 : f32 to vector<1x128xf32>
    %11 = arith.mulf %10, %6 : vector<1x128xf32>
    %12 = arith.mulf %11, %6 : vector<1x128xf32>
    %cst_7 = arith.constant 5.000000e-02 : f32
    %13 = vector.broadcast %cst_7 : f32 to vector<1x128xf32>
    %14 = arith.subf %7, %13 : vector<1x128xf32>
    %cst_8 = arith.constant 1.000000e-01 : f32
    %15 = vector.broadcast %cst_8 : f32 to vector<1x128xf32>
    %16 = arith.mulf %15, %14 : vector<1x128xf32>
    %17 = arith.select %9, %12, %16 : vector<1x128xi1>, vector<1x128xf32>
    %cst_9 = arith.constant 0.000000e+00 : f32
    %18 = vector.broadcast %cst_9 : f32 to vector<1x128xf32>
    %19 = arith.cmpf ogt, %5, %18 : vector<1x128xf32>
    %20 = arith.extui %19 : vector<1x128xi1> to vector<1x128xi32>
    %21 = arith.sitofp %20 : vector<1x128xi32> to vector<1x128xf32>
    %cst_10 = arith.constant 0.000000e+00 : f32
    %22 = vector.broadcast %cst_10 : f32 to vector<1x128xf32>
    %23 = arith.maximumf %4, %22 : vector<1x128xf32>
    %24 = arith.mulf %4, %21 : vector<1x128xf32>
    %25 = arith.subf %23, %24 : vector<1x128xf32>
    %26 = math.absf %4 : vector<1x128xf32>
    %cst_11 = arith.constant 0.000000e+00 : f32
    %27 = vector.broadcast %cst_11 : f32 to vector<1x128xf32>
    %28 = arith.subf %27, %26 : vector<1x128xf32>
    %29 = math.exp %28 : vector<1x128xf32>
    %30 = math.log1p %29 : vector<1x128xf32>
    %31 = arith.addf %25, %30 : vector<1x128xf32>
    %32 = tpu.iota {dimensions = array<i32: 0>} : vector<1x128xi32>
    %c1_i32 = arith.constant 1 : i32
    %33 = arith.muli %arg0, %c1_i32 : i32
    %34 = vector.broadcast %33 : i32 to vector<1x128xi32>
    %35 = arith.addi %32, %34 : vector<1x128xi32>
    %36 = tpu.iota {dimensions = array<i32: 1>} : vector<1x128xi32>
    %c128_i32 = arith.constant 128 : i32
    %37 = vector.broadcast %c128_i32 : i32 to vector<1x128xi32>
    %38 = arith.muli %35, %37 : vector<1x128xi32>
    %39 = arith.addi %38, %36 : vector<1x128xi32>
    %c8_i32 = arith.constant 8 : i32
    %40 = vector.broadcast %c8_i32 : i32 to vector<1x128xi32>
    %41 = arith.cmpi slt, %39, %40 : vector<1x128xi32>
    %cst_12 = arith.constant 0.000000e+00 : f32
    %42 = vector.broadcast %cst_12 : f32 to vector<1x128xf32>
    %43 = arith.select %41, %17, %42 : vector<1x128xi1>, vector<1x128xf32>
    %cst_13 = arith.constant 0.000000e+00 : f32
    %44 = vector.broadcast %cst_13 : f32 to vector<1x128xf32>
    %45 = arith.select %41, %31, %44 : vector<1x128xi1>, vector<1x128xf32>
    %c0_14 = arith.constant 0 : index
    %c0_15 = arith.constant 0 : index
    %46 = vector.load %arg5[%c0_14, %c0_15] : memref<1x128xf32, #tpu.memory_space<vmem>>, vector<1x128xf32>
    %47 = arith.addf %46, %43 : vector<1x128xf32>
    %c0_16 = arith.constant 0 : index
    %c0_17 = arith.constant 0 : index
    %48 = vector.load %arg5[%c0_16, %c0_17] : memref<1x128xf32, #tpu.memory_space<vmem>>, vector<1x128xf32>
    tpu.vector_store %arg5[%c0_16, %c0_17], %47 {strides = array<i32>} : memref<1x128xf32, #tpu.memory_space<vmem>>, vector<1x128xf32>,
    %c0_18 = arith.constant 0 : index
    %c0_19 = arith.constant 0 : index
    %49 = vector.load %arg6[%c0_18, %c0_19] : memref<1x128xf32, #tpu.memory_space<vmem>>, vector<1x128xf32>
    %50 = arith.addf %49, %45 : vector<1x128xf32>
    %c0_20 = arith.constant 0 : index
    %c0_21 = arith.constant 0 : index
    %51 = vector.load %arg6[%c0_20, %c0_21] : memref<1x128xf32, #tpu.memory_space<vmem>>, vector<1x128xf32>
    tpu.vector_store %arg6[%c0_20, %c0_21], %50 {strides = array<i32>} : memref<1x128xf32, #tpu.memory_space<vmem>>, vector<1x128xf32>,
    %c0_i32_22 = arith.constant 0 : i32
    %52 = arith.cmpi eq, %arg0, %c0_i32_22 : i32
    %53 = arith.extui %52 : i1 to i32
    %c0_i32_23 = arith.constant 0 : i32
    %54 = arith.cmpi ne, %53, %c0_i32_23 : i32
    scf.if %54 {
      %c0_24 = arith.constant 0 : index
      %c0_25 = arith.constant 0 : index
      %55 = vector.load %arg5[%c0_24, %c0_25] : memref<1x128xf32, #tpu.memory_space<vmem>>, vector<1x128xf32>
      %56 = vector.shape_cast %55 : vector<1x128xf32> to vector<1x1x128xf32>
      %cst_26 = arith.constant dense<0.000000e+00> : vector<1xf32>
      %57 = vector.multi_reduction <add>, %56, %cst_26 [1, 2] : vector<1x1x128xf32> to vector<1xf32>
      %58 = vector.shape_cast %57 : vector<1xf32> to vector<1x1x1xf32>
      %59 = vector.extract %58[0, 0, 0] : f32 from vector<1x1x1xf32>
      %cst_27 = arith.constant 1.250000e-01 : f32
      %60 = arith.mulf %59, %cst_27 : f32
      %c0_28 = arith.constant 0 : index
      %c0_29 = arith.constant 0 : index
      %61 = vector.load %arg6[%c0_28, %c0_29] : memref<1x128xf32, #tpu.memory_space<vmem>>, vector<1x128xf32>
      %62 = vector.shape_cast %61 : vector<1x128xf32> to vector<1x1x128xf32>
      %cst_30 = arith.constant dense<0.000000e+00> : vector<1xf32>
      %63 = vector.multi_reduction <add>, %62, %cst_30 [1, 2] : vector<1x1x128xf32> to vector<1xf32>
      %64 = vector.shape_cast %63 : vector<1xf32> to vector<1x1x1xf32>
      %65 = vector.extract %64[0, 0, 0] : f32 from vector<1x1x1xf32>
      %cst_31 = arith.constant 1.250000e-01 : f32
      %66 = arith.mulf %65, %cst_31 : f32
      %cst_32 = arith.constant 3.000000e-01 : f32
      %67 = arith.mulf %cst_32, %66 : f32
      %68 = arith.addf %60, %67 : f32
      %69 = tpu.iota {dimensions = array<i32: 1>} : vector<1x128xi32>
      %c0_i32_33 = arith.constant 0 : i32
      %70 = vector.broadcast %c0_i32_33 : i32 to vector<1x128xi32>
      %71 = arith.cmpi eq, %69, %70 : vector<1x128xi32>
      %c1_i32_34 = arith.constant 1 : i32
      %72 = vector.broadcast %c1_i32_34 : i32 to vector<1x128xi32>
      %73 = arith.cmpi eq, %69, %72 : vector<1x128xi32>
      %c2_i32 = arith.constant 2 : i32
      %74 = vector.broadcast %c2_i32 : i32 to vector<1x128xi32>
      %75 = arith.cmpi eq, %69, %74 : vector<1x128xi32>
      %cst_35 = arith.constant 0.000000e+00 : f32
      %76 = vector.broadcast %66 : f32 to vector<1x128xf32>
      %77 = vector.broadcast %cst_35 : f32 to vector<1x128xf32>
      %78 = arith.select %75, %76, %77 : vector<1x128xi1>, vector<1x128xf32>
      %79 = vector.broadcast %60 : f32 to vector<1x128xf32>
      %80 = arith.select %73, %79, %78 : vector<1x128xi1>, vector<1x128xf32>
      %81 = vector.broadcast %68 : f32 to vector<1x128xf32>
      %82 = arith.select %71, %81, %80 : vector<1x128xi1>, vector<1x128xf32>
      %c0_36 = arith.constant 0 : index
      %c0_37 = arith.constant 0 : index
      %83 = vector.load %arg4[%c0_36, %c0_37] : memref<1x128xf32, #tpu.memory_space<vmem>>, vector<1x128xf32>
      tpu.vector_store %arg4[%c0_36, %c0_37], %82 {strides = array<i32>} : memref<1x128xf32, #tpu.memory_space<vmem>>, vector<1x128xf32>,
    } else {
    }
    return
  }
  func.func @transform_0(%arg0: i32) -> (i32, i32) {
    %c0_i32 = arith.constant 0 : i32
    %c0_i32_0 = arith.constant 0 : i32
    return %arg0, %c0_i32 : i32, i32
  }
  func.func @transform_1(%arg0: i32) -> (i32, i32) {
    %c0_i32 = arith.constant 0 : i32
    %c0_i32_0 = arith.constant 0 : i32
    return %arg0, %c0_i32 : i32, i32
  }
  func.func @transform_2(%arg0: i32) -> (i32, i32) {
    %c0_i32 = arith.constant 0 : i32
    %c0_i32_0 = arith.constant 0 : i32
    return %arg0, %c0_i32 : i32, i32
  }
  func.func @transform_3(%arg0: i32) -> (i32, i32) {
    %c0_i32 = arith.constant 0 : i32
    %c0_i32_0 = arith.constant 0 : i32
    %c0_i32_1 = arith.constant 0 : i32
    return %c0_i32, %c0_i32_0 : i32, i32
  }
}

</mosaic_0001>

<bundles_post_ra>
// kernel: tpu_custom_call.1
= control target key start
LH: loop header
LB: loop body
LE: loop exit
PB: predicated region body
PF: predicated region fallthrough
CT: control target
= control target key end

     0   :  { %8 = vsyncpa [#allocation5], 0  ;;  %s260_s0 = inlined_call_operand.hbm [shape: f32[1,128], index: 0, kind: input, shape index: {}]   ;;  %s261_s1 = inlined_call_operand.vmem [shape: f32[1,128], index: 1, kind: input, shape index: {}]   ;;  %s262_s2 = inlined_call_operand.vmem [shape: f32[1,128], index: 2, kind: input, shape index: {}]   ;;  %s263_s3 = inlined_call_operand.hbm [shape: f32[1,128], index: 3, kind: output, shape index: {}]  }
   0x1   :  { %9 = vsyncpa [#allocation6], 0  ;;  %s197_s12 = smov [#allocation4]   ;;  %s149_s16 = scalar_lea.hbm %s260_s0, 16 }
   0x2   :  { %s16_s13 = sshll.u32 %s197_s12, 4  ;;  %p150_p0 = scmp.ne.s32.totalorder %s260_s0, %s149_s16  ;;  %s17_s13 = int_to_ptr.vmem [resolvable:$true] %s16_s13 }
   0x3   :  { %p153_p1 = scmp.lt.u32.totalorder %s149_s16, %s260_s0 }
   0x5   :  { %p155_p2 = pnand %p153_p1, %p150_p0 }
   0x7   :  { %158 = shalt.err (!%p155_p2)
}
   0x8   :  { %s159_s21 = scalar_lea.vmem %s17_s13, 16  ;;  %s163_s22 = scalar_lea.vmem %s17_s13, 32 }
   0x9   :  { %p160_p3 = scmp.ne.s32.totalorder %s17_s13, %s159_s21  ;;  %p164_p4 = scmp.lt.s32.totalorder %s17_s13, %s17_s13 }
   0xa   :  { %p165_p5 = scmp.lt.s32.totalorder %s163_s22, %s159_s21 }
   0xc   :  { %p166_p6 = por %p165_p5, %p164_p4 }
   0xe   :  { %p167_p7 = pnand %p166_p6, %p160_p3 }
  0x10   :  { %170 = shalt.err (!%p167_p7)
}
  0x11   :  { %19 = dma.hbm_to_vmem [thread:$0]  %s260_s0, 16, %s17_s13, [#allocation5]  }
  0x12   :  { %193 = dma.done.wait [#allocation5], 16  }
  0x13   :  { %194 = vsyncadd [#allocation5], 4294967280  ;;  %v64_v0 = vlaneseq  ;;  %v198_v1 = vmov 0.0   ;;  %v33_v5 = vld [vmem:[#allocation4] sm:$0x1]  ;;  %vm85_vm2 = vcmask 1040384  }
  0x14   :  { %31 = vst [vmem:[#allocation2] sm:$0x1] %v198_v1  ;;  %32 = vst [vmem:[#allocation3] sm:$0x1] %v198_v1  ;;  %v34_v6 = vld [vmem:[%s261_s1] sm:$0x1] }
  0x15   :  { %v65_v2 = vshrl.u32 %v64_v0, 7  ;;  %v232_v3 = vand.u32 127, %v64_v0  ;;  %v35_v7 = vld [vmem:[%s262_s2] sm:$0x1]  ;;  %v50_v9 = vand.u32 2147483647, %v34_v6 }
  0x16   :  { %v36_v8 = vsub.f32 %v33_v5, %v35_v7  ;;  %vm44_vm3 = vcmp.gt.f32.partialorder %v35_v7, 0.0  ;;  %v47_v30 = vmax.f32 %v34_v6, 0.0  ;;  %s199_s4 = smov [#allocation7]  }
  0x17   :  { %v70_v4 = vmul.u32 128, %v65_v2  ;;  %v51_v12 = vsub.f32 0.0, %v50_v9  ;;  %v137_v27 = vsel %vm44_vm3, 1.0, %v198_v1  ;;  %vm113_vm5 = vcmp.eq.s32.totalorder %v232_v3, 2  ;;  %s127_s5 = sshll.u32 %s199_s4, 4  ;;  %s128_s5 = int_to_ptr.vmem [resolvable:$true] %s127_s5 }
  0x18   :  { %v37_v10 = vand.u32 2147483647, %v36_v8  ;;  %v39_v11 = vmul.f32 0.5, %v36_v8  ;;  %v48_v29 = vmul.f32 %v137_v27, %v34_v6  ;;  %vm112_vm6 = vcmp.eq.s32.totalorder %v232_v3, 1  ;;  %s171_s7 = scalar_lea.vmem %s128_s5, 16  ;;  %s175_s8 = scalar_lea.vmem %s128_s5, 32 }
  0x19   :  { %v71_v13 = vadd.s32 %v70_v4, %v232_v3  ;;  %v52_v16 = vmul.f32 1.442695, %v51_v12  ;;  %vm111_vm7 = vcmp.eq.s32.totalorder %v232_v3, 0  ;;  %p172_p8 = scmp.ne.s32.totalorder %s128_s5, %s171_s7  ;;  %p176_p9 = scmp.lt.s32.totalorder %s128_s5, %s128_s5 }
  0x1a   :  { %v40_v14 = vmul.f32 %v39_v11, %v36_v8  ;;  %v136_v15 = vadd.f32 -0.05, %v37_v10  ;;  %vm38_vm0 = vcmp.le.f32.partialorder %v37_v10, 0.1  ;;  %v49_v34 = vsub.f32 %v47_v30, %v48_v29  ;;  %p177_p10 = scmp.lt.s32.totalorder %s175_s8, %s171_s7 }
  0x1b   :  { %145 = vpow2.f32 %v52_v16  ;;  %vm72_vm1 = vcmp.lt.s32.totalorder %v71_v13, 8  ;;  %v75_v18 = vld [vmem:[#allocation2] sm:$0x1]  ;;  %v78_v38 = vld [vmem:[#allocation3] sm:$0x1] }
  0x1c   :  { %v42_v17 = vmul.f32 0.1, %v136_v15  ;;  %p178_p11 = por %p177_p10, %p176_p9 }
  0x1e   :  { %v43_v19 = vsel %vm38_vm0, %v40_v14, %v42_v17  ;;  %p179_p12 = pnand %p178_p11, %p172_p8 }
  0x1f   :  { %v73_v20 = vsel %vm72_vm1, %v43_v19, 0.0 }
  0x20   :  { %v76_v21 = vadd.f32 %v75_v18, %v73_v20 }
  0x22   :  { %77 = vst [vmem:[#allocation2] sm:$0x1] %v76_v21 }
  0x25   :  { %v146_v22 = vpop.eup %145 }
  0x26   :  { %v54_v23 = vadd.f32 1.0, %v146_v22  ;;  %v57_v26 = vmul.f32 -0.5, %v146_v22  ;;  %v60_v31 = vand.u32 2147483647, %v146_v22 }
  0x28   :  { %147 = vlog2.f32 %v54_v23  ;;  %v58_v28 = vadd.f32 1.0, %v57_v26  ;;  %vm61_vm4 = vcmp.lt.f32.partialorder %v60_v31, 0.0004427343 }
  0x29   :  { %v84_v24 = vld [vmem:[#allocation2] sm:$0x1] }
  0x2a   :  { %v86_v25 = vsel %vm85_vm2, %v84_v24, 0.0  ;;  %v59_v32 = vmul.f32 %v146_v22, %v58_v28 }
  0x2b   :  { %87 = vadd.xlane.f32.xlu0 %v86_v25 }
  0x32   :  { %v148_v33 = vpop.eup %147 }
  0x33   :  { %v56_v35 = vmul.f32 0.6931472, %v148_v33 }
  0x35   :  { %v62_v36 = vsel %vm61_vm4, %v59_v32, %v56_v35 }
  0x36   :  { %v63_v37 = vadd.f32 %v62_v36, %v49_v34 }
  0x38   :  { %v74_v39 = vsel %vm72_vm1, %v63_v37, 0.0 }
  0x39   :  { %v79_v40 = vadd.f32 %v78_v38, %v74_v39 }
  0x3b   :  { %80 = vst [vmem:[#allocation3] sm:$0x1] %v79_v40 }
  0x42   :  { %v97_v41 = vld [vmem:[#allocation3] sm:$0x1] }
  0x43   :  { %v98_v42 = vsel %vm85_vm2, %v97_v41, 0.0 }
  0x44   :  { %99 = vadd.xlane.f32.xlu0 %v98_v42 }
  0xb8   :  { %v88_v43 = vpop.xlane.xlu0 %87 }
  0xb9   :  { %v89_v44 = vrot.slane %v88_v43, 4 }
  0xbb   :  { %v90_v45 = vadd.f32 %v89_v44, %v88_v43 }
  0xbd   :  { %v91_v46 = vrot.slane %v90_v45, 2 }
  0xbf   :  { %v92_v47 = vadd.f32 %v91_v46, %v90_v45 }
  0xc1   :  { %v93_v48 = vrot.slane %v92_v47, 1 }
  0xc3   :  { %v94_v49 = vadd.f32 %v93_v48, %v92_v47 }
  0xc5   :  { %138 = vpush %v94_v49 }
  0xd1   :  { %v100_v50 = vpop.xlane.xlu0 %99 }
  0xd2   :  { %v101_v51 = vrot.slane %v100_v50, 4 }
  0xd4   :  { %v102_v52 = vadd.f32 %v101_v51, %v100_v50 }
  0xd6   :  { %v103_v53 = vrot.slane %v102_v52, 2 }
  0xd8   :  { %v104_v54 = vadd.f32 %v103_v53, %v102_v52 }
  0xda   :  { %v105_v55 = vrot.slane %v104_v54, 1 }
  0xdc   :  { %v106_v56 = vadd.f32 %v105_v55, %v104_v54 }
  0xde   :  { %140 = vpush %v106_v56 }
  0xf6   :  { %s139_s0 = spop %138 }
  0xf7   :  { %s96_s29 = smul.f32 0.125, %s139_s0 }
  0xf9   :  { %v116_v59 = vstv %s96_s29 }
 0x10f   :  { %s141_s1 = spop %140 }
 0x110   :  { %s108_s2 = smul.f32 0.125, %s141_s1 }
 0x112   :  { %s109_s30 = smul.f32 0.3, %s108_s2  ;;  %v114_v57 = vstv %s108_s2 }
 0x113   :  { %v115_v58 = vsel %vm113_vm5, %v114_v57, 0.0 }
 0x114   :  { %s110_s6 = sadd.f32 %s109_s30, %s96_s29  ;;  %v117_v61 = vsel %vm112_vm6, %v116_v59, %v115_v58 }
 0x116   :  { %v118_v60 = vstv %s110_s6 }
 0x117   :  { %v119_v62 = vsel %vm111_vm7, %v118_v60, %v117_v61 }
 0x118   :  { %120 = vst [vmem:[#allocation7] sm:$0x1] %v119_v62 }
 0x119   :  { %182 = shalt.err (!%p179_p12)
}
 0x11a   :  { %s183_s11 = scalar_lea.hbm %s263_s3, 16 }
 0x11b   :  { %p184_p13 = scmp.ne.s32.totalorder %s263_s3, %s183_s11  ;;  %p187_p0 = scmp.lt.u32.totalorder %s183_s11, %s263_s3 }
 0x11d   :  { %p189_p1 = pnand %p187_p0, %p184_p13 }
 0x11f   :  { %192 = shalt.err (!%p189_p1)
}
 0x120   :  { %130 = dma.vmem_to_hbm [thread:$0]  %s128_s5, 16, %s263_s3, [#allocation6]  }
 0x121   :  { %195 = dma.done.wait [#allocation6], 16  }
 0x122   :  { %196 = vsyncadd [#allocation6], 4294967280 }
 0x123   :  { %134 = vsyncpa [#allocation5], 1 }
 0x124   :  { %135 = vsyncpa [#allocation6], 1 }

</bundles_post_ra>
